<compile_context>
chip_gen: v5e
topology: v5e:2x2
jax: 0.10.0
libtpu: 0.0.40
codegen_flags: <defaults>
</compile_context>

<pallas_src>
import math
import functools

import jax
import jax.numpy as jnp
from jax import lax
from jax.experimental import pallas as pl
from jax.experimental.pallas import tpu as pltpu

_LANE = 128


def _sph_harm_kernel(xyz_ref, out_ref, *, l_values, normalize, integral):
    # xyz_ref: (3, tile_rows, 128) f32    out_ref: (num_feat, tile_rows, 128)
    x = xyz_ref[0]
    y = xyz_ref[1]
    z = xyz_ref[2]

    if normalize:
        # torch.nn.functional.normalize(coords, dim=-1): v / max(||v||, 1e-12).
        # rsqrt(max(||v||^2, 1e-24)) is identical for ||v|| >= 1e-12 and gives
        # the same 1e12 factor below it (1e-24 = (1e-12)^2).  rsqrt goes to the
        # EUP slot -> free under the HBM-bound regime.
        sq = x * x + y * y + z * z
        inv = lax.rsqrt(jnp.maximum(sq, 1e-24))
        x = x * inv
        y = y * inv
        z = z * inv

    # Fold the "integral" normalization into compile-time coefficients.
    scale = (1.0 / math.sqrt(4.0 * math.pi)) if integral else 1.0

    sqrt3 = math.sqrt(3.0)
    sqrt5 = math.sqrt(5.0)
    sqrt7 = math.sqrt(7.0)
    sqrt15 = math.sqrt(15.0)
    sqrt42 = math.sqrt(42.0)
    sqrt168 = math.sqrt(168.0)

    lmax = max(l_values)
    feat_idx = 0

    def emit(v):
        # Direct per-feature store: full (tile_rows, 128) unmasked vst slab.
        nonlocal feat_idx
        out_ref[feat_idx] = v.astype(out_ref.dtype)
        feat_idx += 1

    if 0 in l_values:
        emit(jnp.full_like(x, scale))  # Y_0 = 1 (component convention)

    if lmax >= 1 and 1 in l_values:
        emit((sqrt3 * scale) * x)
        emit((sqrt3 * scale) * y)
        emit((sqrt3 * scale) * z)

    if lmax >= 2:
        y2 = y * y
        x2z2 = x * x + z * z
        xz = x * z
        z2mx2 = z * z - x * x

        if 2 in l_values:
            emit((sqrt15 * scale) * xz)
            emit((sqrt15 * scale) * (x * y))
            emit((sqrt5 * scale) * (y2 - 0.5 * x2z2))
            emit((sqrt15 * scale) * (y * z))
            emit((0.5 * sqrt15 * scale) * z2mx2)

        if lmax >= 3:
            # Unscaled (component-convention) l=2 terms feed the l=3 recurrence.
            sh_2_0 = sqrt15 * xz
            sh_2_4 = (0.5 * sqrt15) * z2mx2
            fy2 = 4.0 * y2 - x2z2

            if 3 in l_values:
                emit(((sqrt42 / 6.0) * scale) * (sh_2_0 * z + sh_2_4 * x))
                emit((sqrt7 * scale) * (sh_2_0 * y))
                emit(((sqrt168 / 8.0) * scale) * (fy2 * x))
                emit((0.5 * sqrt7 * scale) * (y * (2.0 * y2 - 3.0 * x2z2)))
                emit(((sqrt168 / 8.0) * scale) * (z * fy2))
                emit((sqrt7 * scale) * (sh_2_4 * y))
                emit(((sqrt42 / 6.0) * scale) * (sh_2_4 * z - sh_2_0 * x))

    # TODO(synk): l > 3 polynomials (equitriton supports up to l=10) not implemented.
    # If extended, re-derive the bound regime: per-point VALU/vst cost grows
    # ~O(lmax^2) and the kernel can flip from HBM-bound to VALU/vst-bound;
    # at that point hoist shared monomials and keep rsqrt on the EUP slot.


def spherical_harmonic_embedding(
    coords,
    l_values=(0, 1, 2, 3),
    normalize=True,
    normalization="integral",
    max_tile_rows=512,
    out_dtype=jnp.float32,
    output_layout="FN",
    input_layout="N3",
):
    """JAX/Pallas equivalent of SphericalHarmonicEmbedding.forward (use_e3nn=False).

    coords: (N, 3) float array (input_layout="N3", PyTorch layout) or (3, N)
        (input_layout="3N", skips the wrapper transpose pass entirely).
    output_layout="FN" (default) returns the kernel-native lane-dense (F, N)
        slab; "NF" returns (N, F) exactly like the PyTorch module (one extra
        XLA transpose over the output - prefer doing it in the consumer).
    out_dtype=jnp.bfloat16 halves the dominant HBM writeback when the
        consumer tolerates reduced precision.
    """
    l_values = tuple(sorted(set(int(l) for l in l_values)))
    assert max(l_values) <= 3, "only l <= 3 implemented"
    num_feat = sum(2 * l + 1 for l in l_values)

    assert input_layout in ("N3", "3N")
    assert output_layout in ("NF", "FN")
    n = coords.shape[0] if input_layout == "N3" else coords.shape[1]

    out_dtype = jnp.dtype(out_dtype)
    # Sublane granularity of the *output* tile (packed dtypes need 16/32 rows).
    sub = max(8, 32 // out_dtype.itemsize)

    rows_needed = pl.cdiv(n, _LANE)
    max_tile_rows = max(sub, (int(max_tile_rows) // sub) * sub)  # keep <=512: fits
    # default scoped VMEM on v5e/v6e/v7x; 512->1024 measured at only ~+1%.

    if rows_needed <= sub:
        num_steps = 1
    else:
        # >= 2 grid steps so the "parallel" axis can shard across v7x's 2 TCs
        # (no measurable cost on the 1-TC v5e/v6e: ~0.35 us extra per step).
        num_steps = max(pl.cdiv(rows_needed, max_tile_rows), 2)
    # Tile chosen so num_steps * tile_rows barely covers rows_needed:
    # padding waste bounded to < 1 tile instead of padding up to a fixed 512.
    tile_rows = pl.cdiv(pl.cdiv(rows_needed, num_steps), sub) * sub
    rows = num_steps * tile_rows
    n_pad = rows * _LANE

    xyz = jnp.asarray(coords, dtype=jnp.float32)
    if input_layout == "N3":
        xyz = xyz.T  # (3, N); pass "3N" to skip this extra pass over the input
    if n_pad != n:
        xyz = jnp.pad(xyz, ((0, 0), (0, n_pad - n)))
    xyz = xyz.reshape(3, rows, _LANE)

    kernel = functools.partial(
        _sph_harm_kernel,
        l_values=l_values,
        normalize=normalize,
        integral=(normalization == "integral"),
    )

    out = pl.pallas_call(
        kernel,
        out_shape=jax.ShapeDtypeStruct((num_feat, rows, _LANE), out_dtype),
        grid=(num_steps,),
        in_specs=[pl.BlockSpec((3, tile_rows, _LANE), lambda i: (0, i, 0))],
        out_specs=pl.BlockSpec((num_feat, tile_rows, _LANE), lambda i: (0, i, 0)),
        compiler_params=pltpu.CompilerParams(dimension_semantics=("parallel",)),
    )(xyz)

    out = out.reshape(num_feat, n_pad)  # free (metadata only)
    if n_pad != n:
        out = out[:, :n]
    if output_layout == "FN":
        return out  # lane-dense (F, N): no transpose pass
    return out.T  # (N, F), matches the PyTorch module's return layout


def _reference(coords, l_values, normalize=True, normalization="integral"):
    """Pure-JAX reference (same e3nn/equitriton polynomial convention).

    Note: m-ordering / signs follow the e3nn 'component' convention used by
    equitriton's Triton kernels; cross-check once against the PyTorch module
    if bit-exact parity matters (cannot import torch/e3nn here).
    """
    c = jnp.asarray(coords, dtype=jnp.float32)
    if normalize:
        nrm = jnp.linalg.norm(c, axis=-1, keepdims=True)
        c = c / jnp.maximum(nrm, 1e-12)
    x, y, z = c[:, 0], c[:, 1], c[:, 2]
    feats = []
    lset = set(l_values)
    if 0 in lset:
        feats.append(jnp.ones_like(x))
    if 1 in lset:
        feats += [math.sqrt(3.0) * x, math.sqrt(3.0) * y, math.sqrt(3.0) * z]
    y2 = y * y
    x2z2 = x * x + z * z
    sh20 = math.sqrt(15.0) * x * z
    sh24 = 0.5 * math.sqrt(15.0) * (z * z - x * x)
    if 2 in lset:
        feats += [sh20, math.sqrt(15.0) * x * y,
                  math.sqrt(5.0) * (y2 - 0.5 * x2z2),
                  math.sqrt(15.0) * y * z, sh24]
    if 3 in lset:
        feats += [
            (math.sqrt(42.0) / 6.0) * (sh20 * z + sh24 * x),
            math.sqrt(7.0) * sh20 * y,
            (math.sqrt(168.0) / 8.0) * (4.0 * y2 - x2z2) * x,
            0.5 * math.sqrt(7.0) * y * (2.0 * y2 - 3.0 * x2z2),
            (math.sqrt(168.0) / 8.0) * z * (4.0 * y2 - x2z2),
            math.sqrt(7.0) * sh24 * y,
            (math.sqrt(42.0) / 6.0) * (sh24 * z - sh20 * x),
        ]
    out = jnp.stack(feats, axis=-1)
    if normalization == "integral":
        out = out / math.sqrt(4.0 * math.pi)
    return out


if __name__ == "__main__":
    key = jax.random.PRNGKey(0)
    # Small synthetic point cloud, PyTorch-style layout (N, 3).
    coords = jax.random.normal(key, (200, 3), dtype=jnp.float32)
    ref = _reference(coords, [0, 1, 2, 3], normalize=True, normalization="integral")

    # Default: lane-dense (F, N) output (no output transpose pass).
    out_fn = jax.block_until_ready(
        spherical_harmonic_embedding(coords, l_values=[0, 1, 2, 3]))
    assert out_fn.shape == (16, 200), out_fn.shape
    assert out_fn.dtype == jnp.float32
    assert bool(jnp.all(jnp.isfinite(out_fn)))
    assert bool(jnp.allclose(out_fn, ref.T, rtol=1e-5, atol=1e-5))

    # PyTorch-module-exact (N, F) layout.
    out_nf = jax.block_until_ready(
        spherical_harmonic_embedding(coords, l_values=[0, 1, 2, 3],
                                     output_layout="NF"))
    assert out_nf.shape == (200, 16), out_nf.shape
    assert bool(jnp.allclose(out_nf, ref, rtol=1e-5, atol=1e-5))

    # Ragged N with (3, N) input layout (no wrapper transpose) and bf16 output
    # (halved HBM writeback); exercises the >=2-step grid and tail padding.
    coords2 = jax.random.normal(jax.random.PRNGKey(1), (3000, 3), dtype=jnp.float32)
    out2 = jax.block_until_ready(
        spherical_harmonic_embedding(coords2.T, l_values=[0, 1, 2, 3],
                                     input_layout="3N",
                                     out_dtype=jnp.bfloat16))
    ref2 = _reference(coords2, [0, 1, 2, 3]).T
    assert out2.shape == (16, 3000), out2.shape
    assert out2.dtype == jnp.bfloat16
    assert bool(jnp.allclose(out2.astype(jnp.float32), ref2, rtol=2e-2, atol=2e-2))

    print("KERNEL_OK")
</pallas_src>

<mosaic_0001>
module attributes {stable_mosaic.version = 11 : i64} {
  func.func @_sph_harm_kernel(%arg0: i32, %arg1: memref<3x8x128xf32, #tpu.memory_space<vmem>>, %arg2: memref<16x8x128xf32, #tpu.memory_space<vmem>>) attributes {dimension_semantics = [#tpu.dimension_semantics<parallel>], iteration_bounds = array<i64: 1>, scalar_prefetch = 0 : i64, scratch_operands = 0 : i64, tpu.core_type = #tpu.core_type<tc>, window_params = [{transform_indices = @transform_0, window_bounds = array<i64: 3, 8, 128>}, {transform_indices = @transform_1, window_bounds = array<i64: 16, 8, 128>}]} {
    %c0 = arith.constant 0 : index
    %c0_0 = arith.constant 0 : index
    %c0_1 = arith.constant 0 : index
    %0 = vector.load %arg1[%c0, %c0_0, %c0_1] : memref<3x8x128xf32, #tpu.memory_space<vmem>>, vector<1x8x128xf32>
    %1 = vector.shape_cast %0 : vector<1x8x128xf32> to vector<8x128xf32>
    %c1 = arith.constant 1 : index
    %c0_2 = arith.constant 0 : index
    %c0_3 = arith.constant 0 : index
    %2 = vector.load %arg1[%c1, %c0_2, %c0_3] : memref<3x8x128xf32, #tpu.memory_space<vmem>>, vector<1x8x128xf32>
    %3 = vector.shape_cast %2 : vector<1x8x128xf32> to vector<8x128xf32>
    %c2 = arith.constant 2 : index
    %c0_4 = arith.constant 0 : index
    %c0_5 = arith.constant 0 : index
    %4 = vector.load %arg1[%c2, %c0_4, %c0_5] : memref<3x8x128xf32, #tpu.memory_space<vmem>>, vector<1x8x128xf32>
    %5 = vector.shape_cast %4 : vector<1x8x128xf32> to vector<8x128xf32>
    %6 = arith.mulf %1, %1 : vector<8x128xf32>
    %7 = arith.mulf %3, %3 : vector<8x128xf32>
    %8 = arith.addf %6, %7 : vector<8x128xf32>
    %9 = arith.mulf %5, %5 : vector<8x128xf32>
    %10 = arith.addf %8, %9 : vector<8x128xf32>
    %cst = arith.constant 1.000000e-24 : f32
    %11 = vector.broadcast %cst : f32 to vector<8x128xf32>
    %12 = arith.maximumf %10, %11 : vector<8x128xf32>
    %13 = math.rsqrt %12 : vector<8x128xf32>
    %14 = arith.mulf %1, %13 : vector<8x128xf32>
    %15 = arith.mulf %3, %13 : vector<8x128xf32>
    %16 = arith.mulf %5, %13 : vector<8x128xf32>
    %cst_6 = arith.constant 0.282094806 : f32
    %17 = vector.broadcast %cst_6 : f32 to vector<8x128xf32>
    %c0_7 = arith.constant 0 : index
    %c0_8 = arith.constant 0 : index
    %c0_9 = arith.constant 0 : index
    %18 = vector.load %arg2[%c0_7, %c0_8, %c0_9] : memref<16x8x128xf32, #tpu.memory_space<vmem>>, vector<1x8x128xf32>
    %19 = vector.shape_cast %18 : vector<1x8x128xf32> to vector<8x128xf32>
    %20 = vector.shape_cast %17 : vector<8x128xf32> to vector<1x8x128xf32>
    tpu.vector_store %arg2[%c0_7, %c0_8, %c0_9], %20 {strides = array<i32>} : memref<16x8x128xf32, #tpu.memory_space<vmem>>, vector<1x8x128xf32>,
    %cst_10 = arith.constant 0.488602519 : f32
    %21 = vector.broadcast %cst_10 : f32 to vector<8x128xf32>
    %22 = arith.mulf %21, %14 : vector<8x128xf32>
    %c1_11 = arith.constant 1 : index
    %c0_12 = arith.constant 0 : index
    %c0_13 = arith.constant 0 : index
    %23 = vector.load %arg2[%c1_11, %c0_12, %c0_13] : memref<16x8x128xf32, #tpu.memory_space<vmem>>, vector<1x8x128xf32>
    %24 = vector.shape_cast %23 : vector<1x8x128xf32> to vector<8x128xf32>
    %25 = vector.shape_cast %22 : vector<8x128xf32> to vector<1x8x128xf32>
    tpu.vector_store %arg2[%c1_11, %c0_12, %c0_13], %25 {strides = array<i32>} : memref<16x8x128xf32, #tpu.memory_space<vmem>>, vector<1x8x128xf32>,
    %cst_14 = arith.constant 0.488602519 : f32
    %26 = vector.broadcast %cst_14 : f32 to vector<8x128xf32>
    %27 = arith.mulf %26, %15 : vector<8x128xf32>
    %c2_15 = arith.constant 2 : index
    %c0_16 = arith.constant 0 : index
    %c0_17 = arith.constant 0 : index
    %28 = vector.load %arg2[%c2_15, %c0_16, %c0_17] : memref<16x8x128xf32, #tpu.memory_space<vmem>>, vector<1x8x128xf32>
    %29 = vector.shape_cast %28 : vector<1x8x128xf32> to vector<8x128xf32>
    %30 = vector.shape_cast %27 : vector<8x128xf32> to vector<1x8x128xf32>
    tpu.vector_store %arg2[%c2_15, %c0_16, %c0_17], %30 {strides = array<i32>} : memref<16x8x128xf32, #tpu.memory_space<vmem>>, vector<1x8x128xf32>,
    %cst_18 = arith.constant 0.488602519 : f32
    %31 = vector.broadcast %cst_18 : f32 to vector<8x128xf32>
    %32 = arith.mulf %31, %16 : vector<8x128xf32>
    %c3 = arith.constant 3 : index
    %c0_19 = arith.constant 0 : index
    %c0_20 = arith.constant 0 : index
    %33 = vector.load %arg2[%c3, %c0_19, %c0_20] : memref<16x8x128xf32, #tpu.memory_space<vmem>>, vector<1x8x128xf32>
    %34 = vector.shape_cast %33 : vector<1x8x128xf32> to vector<8x128xf32>
    %35 = vector.shape_cast %32 : vector<8x128xf32> to vector<1x8x128xf32>
    tpu.vector_store %arg2[%c3, %c0_19, %c0_20], %35 {strides = array<i32>} : memref<16x8x128xf32, #tpu.memory_space<vmem>>, vector<1x8x128xf32>,
    %36 = arith.mulf %15, %15 : vector<8x128xf32>
    %37 = arith.mulf %14, %14 : vector<8x128xf32>
    %38 = arith.mulf %16, %16 : vector<8x128xf32>
    %39 = arith.addf %37, %38 : vector<8x128xf32>
    %40 = arith.mulf %14, %16 : vector<8x128xf32>
    %41 = arith.mulf %16, %16 : vector<8x128xf32>
    %42 = arith.mulf %14, %14 : vector<8x128xf32>
    %43 = arith.subf %41, %42 : vector<8x128xf32>
    %cst_21 = arith.constant 1.09254849 : f32
    %44 = vector.broadcast %cst_21 : f32 to vector<8x128xf32>
    %45 = arith.mulf %44, %40 : vector<8x128xf32>
    %c4 = arith.constant 4 : index
    %c0_22 = arith.constant 0 : index
    %c0_23 = arith.constant 0 : index
    %46 = vector.load %arg2[%c4, %c0_22, %c0_23] : memref<16x8x128xf32, #tpu.memory_space<vmem>>, vector<1x8x128xf32>
    %47 = vector.shape_cast %46 : vector<1x8x128xf32> to vector<8x128xf32>
    %48 = vector.shape_cast %45 : vector<8x128xf32> to vector<1x8x128xf32>
    tpu.vector_store %arg2[%c4, %c0_22, %c0_23], %48 {strides = array<i32>} : memref<16x8x128xf32, #tpu.memory_space<vmem>>, vector<1x8x128xf32>,
    %49 = arith.mulf %14, %15 : vector<8x128xf32>
    %cst_24 = arith.constant 1.09254849 : f32
    %50 = vector.broadcast %cst_24 : f32 to vector<8x128xf32>
    %51 = arith.mulf %50, %49 : vector<8x128xf32>
    %c5 = arith.constant 5 : index
    %c0_25 = arith.constant 0 : index
    %c0_26 = arith.constant 0 : index
    %52 = vector.load %arg2[%c5, %c0_25, %c0_26] : memref<16x8x128xf32, #tpu.memory_space<vmem>>, vector<1x8x128xf32>
    %53 = vector.shape_cast %52 : vector<1x8x128xf32> to vector<8x128xf32>
    %54 = vector.shape_cast %51 : vector<8x128xf32> to vector<1x8x128xf32>
    tpu.vector_store %arg2[%c5, %c0_25, %c0_26], %54 {strides = array<i32>} : memref<16x8x128xf32, #tpu.memory_space<vmem>>, vector<1x8x128xf32>,
    %cst_27 = arith.constant 5.000000e-01 : f32
    %55 = vector.broadcast %cst_27 : f32 to vector<8x128xf32>
    %56 = arith.mulf %55, %39 : vector<8x128xf32>
    %57 = arith.subf %36, %56 : vector<8x128xf32>
    %cst_28 = arith.constant 0.63078314 : f32
    %58 = vector.broadcast %cst_28 : f32 to vector<8x128xf32>
    %59 = arith.mulf %58, %57 : vector<8x128xf32>
    %c6 = arith.constant 6 : index
    %c0_29 = arith.constant 0 : index
    %c0_30 = arith.constant 0 : index
    %60 = vector.load %arg2[%c6, %c0_29, %c0_30] : memref<16x8x128xf32, #tpu.memory_space<vmem>>, vector<1x8x128xf32>
    %61 = vector.shape_cast %60 : vector<1x8x128xf32> to vector<8x128xf32>
    %62 = vector.shape_cast %59 : vector<8x128xf32> to vector<1x8x128xf32>
    tpu.vector_store %arg2[%c6, %c0_29, %c0_30], %62 {strides = array<i32>} : memref<16x8x128xf32, #tpu.memory_space<vmem>>, vector<1x8x128xf32>,
    %63 = arith.mulf %15, %16 : vector<8x128xf32>
    %cst_31 = arith.constant 1.09254849 : f32
    %64 = vector.broadcast %cst_31 : f32 to vector<8x128xf32>
    %65 = arith.mulf %64, %63 : vector<8x128xf32>
    %c7 = arith.constant 7 : index
    %c0_32 = arith.constant 0 : index
    %c0_33 = arith.constant 0 : index
    %66 = vector.load %arg2[%c7, %c0_32, %c0_33] : memref<16x8x128xf32, #tpu.memory_space<vmem>>, vector<1x8x128xf32>
    %67 = vector.shape_cast %66 : vector<1x8x128xf32> to vector<8x128xf32>
    %68 = vector.shape_cast %65 : vector<8x128xf32> to vector<1x8x128xf32>
    tpu.vector_store %arg2[%c7, %c0_32, %c0_33], %68 {strides = array<i32>} : memref<16x8x128xf32, #tpu.memory_space<vmem>>, vector<1x8x128xf32>,
    %cst_34 = arith.constant 0.546274245 : f32
    %69 = vector.broadcast %cst_34 : f32 to vector<8x128xf32>
    %70 = arith.mulf %69, %43 : vector<8x128xf32>
    %c8 = arith.constant 8 : index
    %c0_35 = arith.constant 0 : index
    %c0_36 = arith.constant 0 : index
    %71 = vector.load %arg2[%c8, %c0_35, %c0_36] : memref<16x8x128xf32, #tpu.memory_space<vmem>>, vector<1x8x128xf32>
    %72 = vector.shape_cast %71 : vector<1x8x128xf32> to vector<8x128xf32>
    %73 = vector.shape_cast %70 : vector<8x128xf32> to vector<1x8x128xf32>
    tpu.vector_store %arg2[%c8, %c0_35, %c0_36], %73 {strides = array<i32>} : memref<16x8x128xf32, #tpu.memory_space<vmem>>, vector<1x8x128xf32>,
    %cst_37 = arith.constant 3.87298346 : f32
    %74 = vector.broadcast %cst_37 : f32 to vector<8x128xf32>
    %75 = arith.mulf %74, %40 : vector<8x128xf32>
    %cst_38 = arith.constant 1.93649173 : f32
    %76 = vector.broadcast %cst_38 : f32 to vector<8x128xf32>
    %77 = arith.mulf %76, %43 : vector<8x128xf32>
    %cst_39 = arith.constant 4.000000e+00 : f32
    %78 = vector.broadcast %cst_39 : f32 to vector<8x128xf32>
    %79 = arith.mulf %78, %36 : vector<8x128xf32>
    %80 = arith.subf %79, %39 : vector<8x128xf32>
    %81 = arith.mulf %75, %16 : vector<8x128xf32>
    %82 = arith.mulf %77, %14 : vector<8x128xf32>
    %83 = arith.addf %81, %82 : vector<8x128xf32>
    %cst_40 = arith.constant 0.304697186 : f32
    %84 = vector.broadcast %cst_40 : f32 to vector<8x128xf32>
    %85 = arith.mulf %84, %83 : vector<8x128xf32>
    %c9 = arith.constant 9 : index
    %c0_41 = arith.constant 0 : index
    %c0_42 = arith.constant 0 : index
    %86 = vector.load %arg2[%c9, %c0_41, %c0_42] : memref<16x8x128xf32, #tpu.memory_space<vmem>>, vector<1x8x128xf32>
    %87 = vector.shape_cast %86 : vector<1x8x128xf32> to vector<8x128xf32>
    %88 = vector.shape_cast %85 : vector<8x128xf32> to vector<1x8x128xf32>
    tpu.vector_store %arg2[%c9, %c0_41, %c0_42], %88 {strides = array<i32>} : memref<16x8x128xf32, #tpu.memory_space<vmem>>, vector<1x8x128xf32>,
    %89 = arith.mulf %75, %15 : vector<8x128xf32>
    %cst_43 = arith.constant 0.746352672 : f32
    %90 = vector.broadcast %cst_43 : f32 to vector<8x128xf32>
    %91 = arith.mulf %90, %89 : vector<8x128xf32>
    %c10 = arith.constant 10 : index
    %c0_44 = arith.constant 0 : index
    %c0_45 = arith.constant 0 : index
    %92 = vector.load %arg2[%c10, %c0_44, %c0_45] : memref<16x8x128xf32, #tpu.memory_space<vmem>>, vector<1x8x128xf32>
    %93 = vector.shape_cast %92 : vector<1x8x128xf32> to vector<8x128xf32>
    %94 = vector.shape_cast %91 : vector<8x128xf32> to vector<1x8x128xf32>
    tpu.vector_store %arg2[%c10, %c0_44, %c0_45], %94 {strides = array<i32>} : memref<16x8x128xf32, #tpu.memory_space<vmem>>, vector<1x8x128xf32>,
    %95 = arith.mulf %80, %14 : vector<8x128xf32>
    %cst_46 = arith.constant 0.457045794 : f32
    %96 = vector.broadcast %cst_46 : f32 to vector<8x128xf32>
    %97 = arith.mulf %96, %95 : vector<8x128xf32>
    %c11 = arith.constant 11 : index
    %c0_47 = arith.constant 0 : index
    %c0_48 = arith.constant 0 : index
    %98 = vector.load %arg2[%c11, %c0_47, %c0_48] : memref<16x8x128xf32, #tpu.memory_space<vmem>>, vector<1x8x128xf32>
    %99 = vector.shape_cast %98 : vector<1x8x128xf32> to vector<8x128xf32>
    %100 = vector.shape_cast %97 : vector<8x128xf32> to vector<1x8x128xf32>
    tpu.vector_store %arg2[%c11, %c0_47, %c0_48], %100 {strides = array<i32>} : memref<16x8x128xf32, #tpu.memory_space<vmem>>, vector<1x8x128xf32>,
    %cst_49 = arith.constant 2.000000e+00 : f32
    %101 = vector.broadcast %cst_49 : f32 to vector<8x128xf32>
    %102 = arith.mulf %101, %36 : vector<8x128xf32>
    %cst_50 = arith.constant 3.000000e+00 : f32
    %103 = vector.broadcast %cst_50 : f32 to vector<8x128xf32>
    %104 = arith.mulf %103, %39 : vector<8x128xf32>
    %105 = arith.subf %102, %104 : vector<8x128xf32>
    %106 = arith.mulf %15, %105 : vector<8x128xf32>
    %cst_51 = arith.constant 0.373176336 : f32
    %107 = vector.broadcast %cst_51 : f32 to vector<8x128xf32>
    %108 = arith.mulf %107, %106 : vector<8x128xf32>
    %c12 = arith.constant 12 : index
    %c0_52 = arith.constant 0 : index
    %c0_53 = arith.constant 0 : index
    %109 = vector.load %arg2[%c12, %c0_52, %c0_53] : memref<16x8x128xf32, #tpu.memory_space<vmem>>, vector<1x8x128xf32>
    %110 = vector.shape_cast %109 : vector<1x8x128xf32> to vector<8x128xf32>
    %111 = vector.shape_cast %108 : vector<8x128xf32> to vector<1x8x128xf32>
    tpu.vector_store %arg2[%c12, %c0_52, %c0_53], %111 {strides = array<i32>} : memref<16x8x128xf32, #tpu.memory_space<vmem>>, vector<1x8x128xf32>,
    %112 = arith.mulf %16, %80 : vector<8x128xf32>
    %cst_54 = arith.constant 0.457045794 : f32
    %113 = vector.broadcast %cst_54 : f32 to vector<8x128xf32>
    %114 = arith.mulf %113, %112 : vector<8x128xf32>
    %c13 = arith.constant 13 : index
    %c0_55 = arith.constant 0 : index
    %c0_56 = arith.constant 0 : index
    %115 = vector.load %arg2[%c13, %c0_55, %c0_56] : memref<16x8x128xf32, #tpu.memory_space<vmem>>, vector<1x8x128xf32>
    %116 = vector.shape_cast %115 : vector<1x8x128xf32> to vector<8x128xf32>
    %117 = vector.shape_cast %114 : vector<8x128xf32> to vector<1x8x128xf32>
    tpu.vector_store %arg2[%c13, %c0_55, %c0_56], %117 {strides = array<i32>} : memref<16x8x128xf32, #tpu.memory_space<vmem>>, vector<1x8x128xf32>,
    %118 = arith.mulf %77, %15 : vector<8x128xf32>
    %cst_57 = arith.constant 0.746352672 : f32
    %119 = vector.broadcast %cst_57 : f32 to vector<8x128xf32>
    %120 = arith.mulf %119, %118 : vector<8x128xf32>
    %c14 = arith.constant 14 : index
    %c0_58 = arith.constant 0 : index
    %c0_59 = arith.constant 0 : index
    %121 = vector.load %arg2[%c14, %c0_58, %c0_59] : memref<16x8x128xf32, #tpu.memory_space<vmem>>, vector<1x8x128xf32>
    %122 = vector.shape_cast %121 : vector<1x8x128xf32> to vector<8x128xf32>
    %123 = vector.shape_cast %120 : vector<8x128xf32> to vector<1x8x128xf32>
    tpu.vector_store %arg2[%c14, %c0_58, %c0_59], %123 {strides = array<i32>} : memref<16x8x128xf32, #tpu.memory_space<vmem>>, vector<1x8x128xf32>,
    %124 = arith.mulf %77, %16 : vector<8x128xf32>
    %125 = arith.mulf %75, %14 : vector<8x128xf32>
    %126 = arith.subf %124, %125 : vector<8x128xf32>
    %cst_60 = arith.constant 0.304697186 : f32
    %127 = vector.broadcast %cst_60 : f32 to vector<8x128xf32>
    %128 = arith.mulf %127, %126 : vector<8x128xf32>
    %c15 = arith.constant 15 : index
    %c0_61 = arith.constant 0 : index
    %c0_62 = arith.constant 0 : index
    %129 = vector.load %arg2[%c15, %c0_61, %c0_62] : memref<16x8x128xf32, #tpu.memory_space<vmem>>, vector<1x8x128xf32>
    %130 = vector.shape_cast %129 : vector<1x8x128xf32> to vector<8x128xf32>
    %131 = vector.shape_cast %128 : vector<8x128xf32> to vector<1x8x128xf32>
    tpu.vector_store %arg2[%c15, %c0_61, %c0_62], %131 {strides = array<i32>} : memref<16x8x128xf32, #tpu.memory_space<vmem>>, vector<1x8x128xf32>,
    return
  }
  func.func @transform_0(%arg0: i32) -> (i32, i32, i32) {
    %c0_i32 = arith.constant 0 : i32
    %c0_i32_0 = arith.constant 0 : i32
    %c0_i32_1 = arith.constant 0 : i32
    return %c0_i32, %arg0, %c0_i32_0 : i32, i32, i32
  }
  func.func @transform_1(%arg0: i32) -> (i32, i32, i32) {
    %c0_i32 = arith.constant 0 : i32
    %c0_i32_0 = arith.constant 0 : i32
    %c0_i32_1 = arith.constant 0 : i32
    return %c0_i32, %arg0, %c0_i32_0 : i32, i32, i32
  }
}

</mosaic_0001>

<bundles_post_ra>
// kernel: tpu_custom_call.1
= control target key start
LH: loop header
LB: loop body
LE: loop exit
PB: predicated region body
PF: predicated region fallthrough
CT: control target
= control target key end

     0   :  { %6 = vsyncpa [#allocation3], 0  ;;  %s228_s0 = inlined_call_operand.hbm [shape: f32[3,8,128], index: 0, kind: input, shape index: {}]   ;;  %s229_s1 = inlined_call_operand.hbm [shape: f32[16,8,128], index: 1, kind: output, shape index: {}]  }
   0x1   :  { %7 = vsyncpa [#allocation4], 0  ;;  %s12_s8 = sshll.u32 %s228_s0, 4  ;;  %s201_s9 = smov [#allocation2]   ;;  %s13_s8 = int_to_ptr.hbm [resolvable:$true] %s12_s8 }
   0x2   :  { %s14_s10 = sshll.u32 %s201_s9, 4  ;;  %s202_s11 = smov 128   ;;  %s15_s10 = int_to_ptr.vmem [resolvable:$true] %s14_s10 }
   0x3   :  { %s203_s12 = smov 8  }
   0x4   :  { %20 = dma.hbm_to_vmem [thread:$0]  %s13_s8, 384, %s15_s10, [#allocation3], %s202_s11, %s202_s11, %s203_s12  }
   0x5   :  { %197 = dma.done.wait [#allocation3], 384  }
   0x6   :  { %198 = vsyncadd [#allocation3], 4294966912  ;;  %v204_v0 = vmov 0.2820948   ;;  %v25_v1 = vld [vmem:[#allocation2] sm:$0xff]  ;;  %v27_v2 = vld [vmem:[#allocation2 + $0x8] sm:$0xff] }
   0x7   :  { %49 = vst [vmem:[#allocation5] sm:$0xff] %v204_v0  ;;  %v29_v3 = vld [vmem:[#allocation2 + $0x10] sm:$0xff]  ;;  %v30_v4 = vmul.f32 %v25_v1, %v25_v1  ;;  %v31_v5 = vmul.f32 %v27_v2, %v27_v2  ;;  %s129_s14 = sshll.u32 %s229_s1, 4  ;;  %s205_s15 = smov [#allocation5]   ;;  %s130_s14 = int_to_ptr.hbm [resolvable:$true] %s129_s14 }
   0x8   :  { %v33_v6 = vmul.f32 %v29_v3, %v29_v3  ;;  %s127_s16 = sshll.u32 %s205_s15, 4  ;;  %s128_s16 = int_to_ptr.vmem [resolvable:$true] %s127_s16 }
   0x9   :  { %v32_v7 = vadd.f32 %v31_v5, %v30_v4 }
   0xb   :  { %v34_v8 = vadd.f32 %v33_v6, %v32_v7 }
   0xd   :  { %v35_v9 = vmax.f32 %v34_v8, 1e-24 }
   0xf   :  { %147 = vrsqrt.f32 %v35_v9  ;;  %vm42_vm0 = vweird.f32 %v35_v9 }
  0x15   :  { %v148_v10 = vpop.eup %147 }
  0x16   :  { %v37_v11 = vmul.f32 %v148_v10, %v35_v9  ;;  %vm43_vm1 = vweird.f32 %v148_v10 }
  0x17   :  { %vm44_vm2 = vmor %vm42_vm0, %vm43_vm1 }
  0x18   :  { %v38_v12 = vmul.f32 %v148_v10, %v37_v11 }
  0x1a   :  { %v39_v13 = vmul.f32 0.5, %v38_v12 }
  0x1c   :  { %v40_v14 = vsub.f32 1.5, %v39_v13 }
  0x1e   :  { %v41_v15 = vmul.f32 %v148_v10, %v40_v14 }
  0x20   :  { %v45_v16 = vsel %vm44_vm2, %v148_v10, %v41_v15 }
  0x21   :  { %v46_v17 = vmul.f32 %v45_v16, %v25_v1  ;;  %v47_v18 = vmul.f32 %v45_v16, %v27_v2  ;;  %v48_v19 = vmul.f32 %v45_v16, %v29_v3 }
  0x23   :  { %v50_v20 = vmul.f32 0.48860252, %v46_v17  ;;  %v53_v21 = vmul.f32 0.48860252, %v47_v18  ;;  %v56_v22 = vmul.f32 0.48860252, %v48_v19  ;;  %v63_v23 = vmul.f32 %v48_v19, %v46_v17 }
  0x24   :  { %v68_v24 = vmul.f32 %v47_v18, %v46_v17  ;;  %v59_v25 = vmul.f32 %v47_v18, %v47_v18  ;;  %v60_v26 = vmul.f32 %v46_v17, %v46_v17  ;;  %v61_v27 = vmul.f32 %v48_v19, %v48_v19 }
  0x25   :  { %52 = vst [vmem:[#allocation5 + $0x8] sm:$0xff] %v50_v20  ;;  %v65_v28 = vmul.f32 1.0925485, %v63_v23  ;;  %v84_v29 = vmul.f32 3.8729835, %v63_v23  ;;  %v77_v30 = vmul.f32 %v48_v19, %v47_v18 }
  0x26   :  { %55 = vst [vmem:[#allocation5 + $0x10] sm:$0xff] %v53_v21  ;;  %v69_v31 = vmul.f32 1.0925485, %v68_v24  ;;  %v62_v32 = vadd.f32 %v61_v27, %v60_v26  ;;  %v64_v33 = vsub.f32 %v61_v27, %v60_v26  ;;  %v86_v34 = vmul.f32 4.0, %v59_v25 }
  0x27   :  { %58 = vst [vmem:[#allocation5 + $0x18] sm:$0xff] %v56_v22  ;;  %v78_v35 = vmul.f32 1.0925485, %v77_v30  ;;  %v88_v36 = vmul.f32 %v84_v29, %v48_v19  ;;  %v94_v37 = vmul.f32 %v84_v29, %v47_v18  ;;  %v102_v38 = vmul.f32 2.0, %v59_v25 }
  0x28   :  { %67 = vst [vmem:[#allocation5 + $0x20] sm:$0xff] %v65_v28  ;;  %v72_v39 = vmul.f32 0.5, %v62_v32  ;;  %v81_v40 = vmul.f32 0.54627424, %v64_v33  ;;  %v85_v41 = vmul.f32 1.9364917, %v64_v33  ;;  %v87_v42 = vsub.f32 %v86_v34, %v62_v32 }
  0x29   :  { %71 = vst [vmem:[#allocation5 + $0x28] sm:$0xff] %v69_v31  ;;  %v95_v43 = vmul.f32 0.7463527, %v94_v37  ;;  %v103_v44 = vmul.f32 3.0, %v62_v32  ;;  %v118_v45 = vmul.f32 %v84_v29, %v46_v17 }
  0x2a   :  { %v73_v46 = vsub.f32 %v59_v25, %v72_v39  ;;  %80 = vst [vmem:[#allocation5 + $0x38] sm:$0xff] %v78_v35  ;;  %v89_v47 = vmul.f32 %v85_v41, %v46_v17  ;;  %v98_v48 = vmul.f32 %v87_v42, %v46_v17  ;;  %v109_v49 = vmul.f32 %v87_v42, %v48_v19 }
  0x2b   :  { %83 = vst [vmem:[#allocation5 + $0x40] sm:$0xff] %v81_v40  ;;  %v104_v50 = vsub.f32 %v102_v38, %v103_v44  ;;  %v113_v51 = vmul.f32 %v85_v41, %v47_v18  ;;  %v117_v52 = vmul.f32 %v85_v41, %v48_v19 }
  0x2c   :  { %v74_v53 = vmul.f32 0.63078314, %v73_v46  ;;  %v90_v54 = vadd.f32 %v89_v47, %v88_v36  ;;  %97 = vst [vmem:[#allocation5 + $0x50] sm:$0xff] %v95_v43  ;;  %v99_v55 = vmul.f32 0.4570458, %v98_v48 }
  0x2d   :  { %v105_v56 = vmul.f32 %v104_v50, %v47_v18  ;;  %v119_v57 = vsub.f32 %v117_v52, %v118_v45  ;;  %v110_v59 = vmul.f32 0.4570458, %v109_v49  ;;  %v114_v61 = vmul.f32 0.7463527, %v113_v51 }
  0x2e   :  { %76 = vst [vmem:[#allocation5 + $0x30] sm:$0xff] %v74_v53  ;;  %v91_v58 = vmul.f32 0.3046972, %v90_v54 }
  0x2f   :  { %101 = vst [vmem:[#allocation5 + $0x58] sm:$0xff] %v99_v55  ;;  %v106_v60 = vmul.f32 0.37317634, %v105_v56  ;;  %v120_v62 = vmul.f32 0.3046972, %v119_v57 }
  0x30   :  { %93 = vst [vmem:[#allocation5 + $0x48] sm:$0xff] %v91_v58 }
  0x31   :  { %108 = vst [vmem:[#allocation5 + $0x60] sm:$0xff] %v106_v60 }
  0x32   :  { %112 = vst [vmem:[#allocation5 + $0x68] sm:$0xff] %v110_v59 }
  0x33   :  { %116 = vst [vmem:[#allocation5 + $0x70] sm:$0xff] %v114_v61 }
  0x34   :  { %122 = vst [vmem:[#allocation5 + $0x78] sm:$0xff] %v120_v62 }
  0x35   :  { %135 = dma.vmem_to_hbm [thread:$0]  %s128_s16, 2048, %s130_s14, [#allocation4], %s202_s11, %s202_s11, %s203_s12  }
  0x36   :  { %199 = dma.done.wait [#allocation4], 2048  }
  0x37   :  { %200 = vsyncadd [#allocation4], 4294965248 }
  0x38   :  { %140 = vsyncpa [#allocation3], 1 }
  0x39   :  { %141 = vsyncpa [#allocation4], 1 }

</bundles_post_ra>
